<compile_context>
chip_gen: v7x
topology: tpu7x:2x2x1
jax: 0.10.0
libtpu: 0.0.40
codegen_flags: <defaults>
</compile_context>

<pallas_src>
import functools

import jax
import jax.numpy as jnp
from jax.experimental import pallas as pl
from jax.experimental.pallas import tpu as pltpu


def _conv1x1_kernel(x_ref, w_ref, b_ref, o_ref):
    # x_ref: (C, T)   activation tile (lanes = spatial pixels)
    # w_ref: (O, C)   1x1 conv weight (VMEM-resident across the grid)
    # b_ref: (O, 1)   bias            (VMEM-resident)
    # o_ref: (O, T)   output tile     (lane-dense in-bounds store)
    o_ref[...] = (
        jnp.dot(w_ref[...], x_ref[...], preferred_element_type=jnp.float32)
        + b_ref[...]
    ).astype(o_ref.dtype)


def _round_up(x, m):
    return (x + m - 1) // m * m


def _pick_tile(hw, c, o, n, itemsize=4, max_tile=4096, vmem_budget=24 << 20):
    """Largest 128-multiple spatial tile fitting the double-buffered VMEM budget.

    No divisibility requirement on hw: the ragged last block is masked by
    Pallas, and since the tile stays a multiple of 128 the in-bounds stores
    remain lane-dense.
    """
    per_col = 2 * (c + o) * itemsize  # double-buffered in+out bytes per spatial column
    t = max_tile
    while t > 128 and per_col * t > vmem_budget:
        t //= 2
    if t >= hw:
        # One block covers the whole spatial extent: use the exact extent
        # (block == full dim is always legal, no edge masking needed) ...
        t = hw
        # ... unless that would leave a single program instance on a 1-batch
        # input; split so v7x's two TensorCores both get work.
        if n == 1 and hw > 256:
            t = _round_up((hw + 1) // 2, 128)
    return t


def bbox_head_forward(x, weight, bias, num_anchors=3):
    """x: (N, C, H, W) f32, weight: (O, C), bias: (O,) -> (N, H*W*A, 4)."""
    n, c, h, w = x.shape
    o = weight.shape[0]
    hw = h * w
    itemsize = jnp.dtype(jnp.float32).itemsize

    tile = _pick_tile(hw, c, o, n, itemsize=itemsize)
    grid = (n, pl.cdiv(hw, tile))

    x2 = x.reshape(n, c, hw)          # free reshape, stays in NCHW order
    b2 = bias.reshape(o, 1)

    # Explicit scoped-VMEM limit: double-buffered activation/output tiles plus
    # resident weight/bias, with 2x headroom, capped under v7x's 64 MiB VMEM.
    needed = 2 * (c + o) * tile * itemsize + 2 * (o * c + o) * itemsize
    vmem_limit = int(min(max(2 * needed, 8 << 20), 48 << 20))

    cost = pl.CostEstimate(
        flops=2 * n * c * o * hw,
        transcendentals=0,
        bytes_accessed=(n * c * hw + n * o * hw + o * c + o) * itemsize,
    )

    out = pl.pallas_call(
        _conv1x1_kernel,
        grid=grid,
        in_specs=[
            pl.BlockSpec((None, c, tile), lambda i, j: (i, 0, j)),  # streamed tiles
            pl.BlockSpec((o, c), lambda i, j: (0, 0)),              # resident W
            pl.BlockSpec((o, 1), lambda i, j: (0, 0)),              # resident b
        ],
        out_specs=pl.BlockSpec((None, o, tile), lambda i, j: (i, 0, j)),
        out_shape=jax.ShapeDtypeStruct((n, o, hw), jnp.float32),
        compiler_params=pltpu.CompilerParams(
            dimension_semantics=("parallel", "parallel"),
            vmem_limit_bytes=vmem_limit,
        ),
        cost_estimate=cost,
    )(x2, weight, b2)

    # (N, O, HW) -> (N, HW, O) -> (N, HW*A, 4): tiny 12-channel tensor, XLA glue.
    # TODO(synk): fuse this epilogue transpose in-kernel only if profiling shows it >5% of op time.
    return jnp.transpose(out, (0, 2, 1)).reshape(n, hw * num_anchors, 4)


# ----------------------------------------------------------------------------
# Pure-JAX reference (exact PyTorch semantics) for a correctness check.
# ----------------------------------------------------------------------------
def ref_forward(x, weight, bias, num_anchors=3):
    n, c, h, w = x.shape
    out = jnp.einsum(
        "nchw,oc->nohw", x, weight, precision=jax.lax.Precision.HIGHEST
    ) + bias.reshape(1, -1, 1, 1)
    out = jnp.transpose(out, (0, 2, 3, 1))           # NCHW -> NHWC
    return out.reshape(n, h * w * num_anchors, 4)


def _check(x, weight, bias, num_anchors):
    fwd = jax.jit(functools.partial(bbox_head_forward, num_anchors=num_anchors))
    out = jax.block_until_ready(fwd(x, weight, bias))
    n, _, h, w = x.shape
    assert out.shape == (n, h * w * num_anchors, 4), out.shape
    assert bool(jnp.all(jnp.isfinite(out)))
    ref = ref_forward(x, weight, bias, num_anchors)
    rel_err = float(jnp.max(jnp.abs(out - ref)) / (jnp.max(jnp.abs(ref)) + 1e-6))
    assert rel_err < 1e-3, rel_err


if __name__ == "__main__":
    key = jax.random.PRNGKey(0)
    kx, kw, kb, kx2 = jax.random.split(key, 4)

    # Shapes consistent with the module defaults: inchannels=512, num_anchors=3.
    A = 3
    O = 4 * A
    C = 512

    weight = jax.random.normal(kw, (O, C), jnp.float32) * (C ** -0.5)
    bias = 0.01 * jax.random.normal(kb, (O,), jnp.float32)

    # Case 1: batch=2, 16x16 feature map (power-of-two spatial extent).
    x1 = jax.random.normal(kx, (2, C, 16, 16), jnp.float32)
    _check(x1, weight, bias, A)

    # Case 2: batch=1, 20x20 feature map -> exercises the ragged-edge grid
    # (pl.cdiv) path and the megacore tile split for N == 1.
    x2 = jax.random.normal(kx2, (1, C, 20, 20), jnp.float32)
    _check(x2, weight, bias, A)

    print("KERNEL_OK")
</pallas_src>

<mosaic_0001>
module attributes {stable_mosaic.version = 11 : i64} {
  func.func @_conv1x1_kernel(%arg0: i32, %arg1: i32, %arg2: memref<1x512x256xf32, #tpu.memory_space<vmem>>, %arg3: memref<12x512xf32, #tpu.memory_space<vmem>>, %arg4: memref<12x1xf32, #tpu.memory_space<vmem>>, %arg5: memref<1x12x256xf32, #tpu.memory_space<vmem>>) attributes {dimension_semantics = [#tpu.dimension_semantics<parallel>, #tpu.dimension_semantics<parallel>], iteration_bounds = array<i64: 2, 1>, scalar_prefetch = 0 : i64, scratch_operands = 0 : i64, tpu.core_type = #tpu.core_type<tc>, window_params = [{transform_indices = @transform_0, window_bounds = array<i64: 1, 512, 256>}, {pipeline_mode = #tpu.pipeline_mode<synchronous>, transform_indices = @transform_1, window_bounds = array<i64: 12, 512>}, {pipeline_mode = #tpu.pipeline_mode<synchronous>, transform_indices = @transform_2, window_bounds = array<i64: 12, 1>}, {transform_indices = @transform_3, window_bounds = array<i64: 1, 12, 256>}]} {
    %c0 = arith.constant 0 : index
    %c0_0 = arith.constant 0 : index
    %0 = vector.load %arg3[%c0, %c0_0] : memref<12x512xf32, #tpu.memory_space<vmem>>, vector<12x512xf32>
    %c0_1 = arith.constant 0 : index
    %c0_2 = arith.constant 0 : index
    %c0_3 = arith.constant 0 : index
    %1 = vector.load %arg2[%c0_1, %c0_2, %c0_3] : memref<1x512x256xf32, #tpu.memory_space<vmem>>, vector<1x512x256xf32>
    %2 = vector.shape_cast %1 : vector<1x512x256xf32> to vector<512x256xf32>
    %cst = arith.constant dense<0.000000e+00> : vector<12x256xf32>
    %3 = tpu.matmul %0, %2, %cst {dimension_numbers = #tpu.dot_dimension_numbers<[1], [0], [0], [1], [0, 0, 1, 1], [], []>} : vector<12x512xf32>, vector<512x256xf32>, vector<12x256xf32> -> vector<12x256xf32>
    %c0_4 = arith.constant 0 : index
    %c0_5 = arith.constant 0 : index
    %4 = vector.load %arg4[%c0_4, %c0_5] : memref<12x1xf32, #tpu.memory_space<vmem>>, vector<12x1xf32>
    %5 = vector.broadcast %4 : vector<12x1xf32> to vector<12x256xf32>
    %6 = arith.addf %3, %5 : vector<12x256xf32>
    %c0_6 = arith.constant 0 : index
    %c0_7 = arith.constant 0 : index
    %c0_8 = arith.constant 0 : index
    %7 = vector.load %arg5[%c0_6, %c0_7, %c0_8] : memref<1x12x256xf32, #tpu.memory_space<vmem>>, vector<1x12x256xf32>
    %8 = vector.shape_cast %7 : vector<1x12x256xf32> to vector<12x256xf32>
    %9 = vector.shape_cast %6 : vector<12x256xf32> to vector<1x12x256xf32>
    tpu.vector_store %arg5[%c0_6, %c0_7, %c0_8], %9 {strides = array<i32>} : memref<1x12x256xf32, #tpu.memory_space<vmem>>, vector<1x12x256xf32>,
    return
  }
  func.func @transform_0(%arg0: i32, %arg1: i32) -> (i32, i32, i32) {
    %c0_i32 = arith.constant 0 : i32
    %c0_i32_0 = arith.constant 0 : i32
    return %arg0, %c0_i32, %arg1 : i32, i32, i32
  }
  func.func @transform_1(%arg0: i32, %arg1: i32) -> (i32, i32) {
    %c0_i32 = arith.constant 0 : i32
    %c0_i32_0 = arith.constant 0 : i32
    %c0_i32_1 = arith.constant 0 : i32
    return %c0_i32, %c0_i32_0 : i32, i32
  }
  func.func @transform_2(%arg0: i32, %arg1: i32) -> (i32, i32) {
    %c0_i32 = arith.constant 0 : i32
    %c0_i32_0 = arith.constant 0 : i32
    %c0_i32_1 = arith.constant 0 : i32
    return %c0_i32, %c0_i32_0 : i32, i32
  }
  func.func @transform_3(%arg0: i32, %arg1: i32) -> (i32, i32, i32) {
    %c0_i32 = arith.constant 0 : i32
    %c0_i32_0 = arith.constant 0 : i32
    return %arg0, %c0_i32, %arg1 : i32, i32, i32
  }
}

</mosaic_0001>

<bundles_post_ra>
// kernel: bbox_head_forward.1
= control target key start
LH: loop header
LB: loop body
LE: loop exit
PB: predicated region body
PF: predicated region fallthrough
CT: control target
= control target key end

     0   :  { %s823_s12 = smov 0   ;;  %s825_s13 = smov 0   ;;  %s1020_s0 = inlined_call_operand.vmem [shape: f32[2,512,256], index: 0, kind: input, shape index: {}]   ;;  %s1021_s1 = inlined_call_operand.vmem [shape: f32[12,512], index: 1, kind: input, shape index: {}]   ;;  %s1022_s2 = inlined_call_operand.vmem [shape: f32[12,1], index: 2, kind: input, shape index: {}]   ;;  %s1023_s3 = inlined_call_operand.vmem [shape: f32[2,12,256], index: 3, kind: output, shape index: {}]  }
   0x1   :  { %s827_s14 = smov 0  }
   0x2 LB: > { %s25_s15 = sadd.s32 1, %s796_s13  ;;  %p607_p0 = scmp.ge.s32.totalorder %s800_s14, 1  ;;  %s800_s14 = sphi %s827_s14, %s13_s14   ;;  %s796_s13 = sphi %s825_s13, %s1025_s13   ;;  %s792_s12 = sphi %s823_s12, %s1024_s12  }
   0x3   : > { %p27_p1 = scmp.ge.s32.totalorder %s25_s15, 2  ;;  %p158_p2 = scmp.lt.s32.totalorder %s800_s14, 3 }
   0x5   : > { %s1027_s15 = smov (%p27_p1, %s25_s15), 0  ;;  %p159_p3 = pnand %p607_p0, %p158_p2 }
   0x6   : > { %p191_p4 = scmp.lt.s32.totalorder (!%p159_p3), %s792_s12, 1  ;;  %v211_v0 = vld [vmem:[%s1021_s1 + $0x8] sm:$0xff] (!%p159_p3)  ;;  %v213_v1 = vld [vmem:[%s1021_s1 + $0x18] sm:$0xff] (!%p159_p3)  ;;  %v802_v2 = vmov (!%p159_p3), 0   ;;  %v346_v3 = vld [vmem:[%s1022_s2] sm:$0xff] (!%p159_p3) }
   0x7   : > { %162 = sbr.rel (%p159_p3) target bundleno = 306 (0x132), region = 32  ;;  %422 = vmatprep.mubr.f32.mxu1 (!%p159_p3), %v211_v0  ;;  %499 = vmatprep.mubr.f32.mxu0 (!%p159_p3), %v213_v1  ;;  %v347_v4 = vld [vmem:[%s1022_s2 + $0x8] sm:$0xf] (!%p159_p3) }
   0x8   : > { %777 = vset.pattern.permute.xlu0 (!%p159_p3), %v802_v2 }
   0x9   : > { %350 = vperm.xlu0 (!%p159_p3), %777, %v346_v3  }
   0xd   : > { %355 = vperm.xlu0 (!%p159_p3), %777, %v347_v4  }
   0xe   : > { %s1029_s12 = smov (!%p191_p4, %s792_s12), 1 }
   0xf   : > { %s614_s22 = sshll.u32 %s1029_s12, 10  ;;  %s615_s17 = sshll.u32 %s1029_s12, 5 }
  0x10   : > { %s859_s27 = scalar_lea.vmem %s1020_s0, %s614_s22  ;;  %s208_s20 = scalar_lea.vmem %s1023_s3, %s615_s17 }
  0x11   : > { %v219_v5 = vld [vmem:[%s859_s27 + $0x8] sm:$0xff]  ;;  %v221_v6 = vld [vmem:[%s859_s27 + $0x18] sm:$0xff]  ;;  %v218_v7 = vld [vmem:[%s859_s27] sm:$0xff] }
  0x12   : > { %v616_v8 = vpack.c.bf16 %v221_v6, %v219_v5  ;;  %v220_v9 = vld [vmem:[%s859_s27 + $0x10] sm:$0xff]  ;;  %v283_v10 = vld [vmem:[%s859_s27 + $0x208] sm:$0xff]  ;;  %v285_v11 = vld [vmem:[%s859_s27 + $0x218] sm:$0xff] }
  0x13   : > { %v618_v12 = vpack.c.bf16 %v220_v9, %v218_v7  ;;  %v680_v13 = vpack.c.bf16 %v285_v11, %v283_v10  ;;  %v282_v14 = vld [vmem:[%s859_s27 + $0x200] sm:$0xff]  ;;  %v284_v15 = vld [vmem:[%s859_s27 + $0x210] sm:$0xff]  ;;  %v223_v16 = vld [vmem:[%s859_s27 + $0x28] sm:$0xff] }
  0x14   : > { %617 = vmatprep.subr.bf16.mxu1 %v616_v8  ;;  %v682_v17 = vpack.c.bf16 %v284_v15, %v282_v14  ;;  %v225_v18 = vld [vmem:[%s859_s27 + $0x38] sm:$0xff]  ;;  %v222_v19 = vld [vmem:[%s859_s27 + $0x20] sm:$0xff]  ;;  %v224_v20 = vld [vmem:[%s859_s27 + $0x30] sm:$0xff] }
  0x15   : > { %619 = vmatpush1.bf16.msra.mxu1 %v618_v12  ;;  %681 = vmatprep.subr.bf16.mxu0 %v680_v13  ;;  %v620_v21 = vpack.c.bf16 %v225_v18, %v223_v16  ;;  %v622_v22 = vpack.c.bf16 %v224_v20, %v222_v19  ;;  %v287_v23 = vld [vmem:[%s859_s27 + $0x228] sm:$0xff]  ;;  %v289_v24 = vld [vmem:[%s859_s27 + $0x238] sm:$0xff]  ;;  %v286_v25 = vld [vmem:[%s859_s27 + $0x220] sm:$0xff] }
  0x16   : > { %683 = vmatpush1.bf16.msra.mxu0 %v682_v17  ;;  %v684_v26 = vpack.c.bf16 %v289_v24, %v287_v23  ;;  %v288_v27 = vld [vmem:[%s859_s27 + $0x230] sm:$0xff]  ;;  %v227_v28 = vld [vmem:[%s859_s27 + $0x48] sm:$0xff]  ;;  %v229_v29 = vld [vmem:[%s859_s27 + $0x58] sm:$0xff] }
  0x17   : > { %621 = vmatprep.subr.bf16.mxu1 %v620_v21  ;;  %v686_v30 = vpack.c.bf16 %v288_v27, %v286_v25  ;;  %v624_v31 = vpack.c.bf16 %v229_v29, %v227_v28  ;;  %v226_v32 = vld [vmem:[%s859_s27 + $0x40] sm:$0xff]  ;;  %v228_v33 = vld [vmem:[%s859_s27 + $0x50] sm:$0xff]  ;;  %v291_v34 = vld [vmem:[%s859_s27 + $0x248] sm:$0xff] }
  0x18   : > { %685 = vmatprep.subr.bf16.mxu0 %v684_v26  ;;  %v293_v35 = vld [vmem:[%s859_s27 + $0x258] sm:$0xff]  ;;  %v290_v36 = vld [vmem:[%s859_s27 + $0x240] sm:$0xff]  ;;  %v292_v37 = vld [vmem:[%s859_s27 + $0x250] sm:$0xff]  ;;  %v626_v38 = vpack.c.bf16 %v228_v33, %v226_v32 }
  0x19   : > { %623 = vmatpush1.bf16.msra.mxu1 %v622_v22  ;;  %v688_v39 = vpack.c.bf16 %v293_v35, %v291_v34  ;;  %v231_v40 = vld [vmem:[%s859_s27 + $0x68] sm:$0xff]  ;;  %v233_v41 = vld [vmem:[%s859_s27 + $0x78] sm:$0xff]  ;;  %v230_v42 = vld [vmem:[%s859_s27 + $0x60] sm:$0xff]  ;;  %v690_v43 = vpack.c.bf16 %v292_v37, %v290_v36 }
  0x1a   : > { %687 = vmatpush1.bf16.msra.mxu0 %v686_v30  ;;  %625 = vmatprep.subr.bf16.mxu1 %v624_v31  ;;  %v628_v44 = vpack.c.bf16 %v233_v41, %v231_v40  ;;  %v232_v45 = vld [vmem:[%s859_s27 + $0x70] sm:$0xff]  ;;  %v295_v46 = vld [vmem:[%s859_s27 + $0x268] sm:$0xff]  ;;  %v297_v47 = vld [vmem:[%s859_s27 + $0x278] sm:$0xff] }
  0x1b   : > { %689 = vmatprep.subr.bf16.mxu0 %v688_v39  ;;  %v692_v48 = vpack.c.bf16 %v297_v47, %v295_v46  ;;  %v294_v49 = vld [vmem:[%s859_s27 + $0x260] sm:$0xff]  ;;  %v296_v50 = vld [vmem:[%s859_s27 + $0x270] sm:$0xff]  ;;  %v235_v51 = vld [vmem:[%s859_s27 + $0x88] sm:$0xff]  ;;  %v630_v53 = vpack.c.bf16 %v232_v45, %v230_v42 }
  0x1c   : > { %v237_v52 = vld [vmem:[%s859_s27 + $0x98] sm:$0xff]  ;;  %v299_v54 = vld [vmem:[%s859_s27 + $0x288] sm:$0xff]  ;;  %v694_v56 = vpack.c.bf16 %v296_v50, %v294_v49  ;;  %v234_v58 = vld [vmem:[%s859_s27 + $0x80] sm:$0xff] }
  0x1d   : > { %627 = vmatpush1.bf16.msra.mxu1 %v626_v38  ;;  %v301_v55 = vld [vmem:[%s859_s27 + $0x298] sm:$0xff]  ;;  %v632_v57 = vpack.c.bf16 %v237_v52, %v235_v51  ;;  %v236_v59 = vld [vmem:[%s859_s27 + $0x90] sm:$0xff]  ;;  %v298_v60 = vld [vmem:[%s859_s27 + $0x280] sm:$0xff] }
  0x1e   : > { %691 = vmatpush1.bf16.msra.mxu0 %v690_v43  ;;  %629 = vmatprep.subr.bf16.mxu1 %v628_v44  ;;  %v696_v61 = vpack.c.bf16 %v301_v55, %v299_v54  ;;  %v300_v62 = vld [vmem:[%s859_s27 + $0x290] sm:$0xff]  ;;  %v239_v63 = vld [vmem:[%s859_s27 + $0xa8] sm:$0xff]  ;;  %v241_v0 = vld [vmem:[%s859_s27 + $0xb8] sm:$0xff]  ;;  %v634_v3 = vpack.c.bf16 %v236_v59, %v234_v58 }
  0x1f   : > { %693 = vmatprep.subr.bf16.mxu0 %v692_v48  ;;  %v303_v1 = vld [vmem:[%s859_s27 + $0x2a8] sm:$0xff]  ;;  %v305_v2 = vld [vmem:[%s859_s27 + $0x2b8] sm:$0xff]  ;;  %v698_v4 = vpack.c.bf16 %v300_v62, %v298_v60  ;;  %v636_v5 = vpack.c.bf16 %v241_v0, %v239_v63  ;;  %v238_v6 = vld [vmem:[%s859_s27 + $0xa0] sm:$0xff] }
  0x20   : > { %v240_v7 = vld [vmem:[%s859_s27 + $0xb0] sm:$0xff]  ;;  %v302_v8 = vld [vmem:[%s859_s27 + $0x2a0] sm:$0xff]  ;;  %v700_v9 = vpack.c.bf16 %v305_v2, %v303_v1  ;;  %v243_v11 = vld [vmem:[%s859_s27 + $0xc8] sm:$0xff] }
  0x21   : > { %631 = vmatpush1.bf16.msra.mxu1 %v630_v53  ;;  %v304_v10 = vld [vmem:[%s859_s27 + $0x2b0] sm:$0xff]  ;;  %v245_v12 = vld [vmem:[%s859_s27 + $0xd8] sm:$0xff]  ;;  %v307_v13 = vld [vmem:[%s859_s27 + $0x2c8] sm:$0xff]  ;;  %v638_v15 = vpack.c.bf16 %v240_v7, %v238_v6 }
  0x22   : > { %695 = vmatpush1.bf16.msra.mxu0 %v694_v56  ;;  %633 = vmatprep.subr.bf16.mxu1 %v632_v57  ;;  %v309_v14 = vld [vmem:[%s859_s27 + $0x2d8] sm:$0xff]  ;;  %v702_v16 = vpack.c.bf16 %v304_v10, %v302_v8  ;;  %v640_v17 = vpack.c.bf16 %v245_v12, %v243_v11  ;;  %v242_v18 = vld [vmem:[%s859_s27 + $0xc0] sm:$0xff]  ;;  %v244_v19 = vld [vmem:[%s859_s27 + $0xd0] sm:$0xff] }
  0x23   : > { %697 = vmatprep.subr.bf16.mxu0 %v696_v61  ;;  %v306_v20 = vld [vmem:[%s859_s27 + $0x2c0] sm:$0xff]  ;;  %v704_v21 = vpack.c.bf16 %v309_v14, %v307_v13  ;;  %v308_v22 = vld [vmem:[%s859_s27 + $0x2d0] sm:$0xff]  ;;  %v247_v23 = vld [vmem:[%s859_s27 + $0xe8] sm:$0xff]  ;;  %v642_v27 = vpack.c.bf16 %v244_v19, %v242_v18 }
  0x24   : > { %v249_v24 = vld [vmem:[%s859_s27 + $0xf8] sm:$0xff]  ;;  %v311_v25 = vld [vmem:[%s859_s27 + $0x2e8] sm:$0xff]  ;;  %v706_v28 = vpack.c.bf16 %v308_v22, %v306_v20  ;;  %v246_v30 = vld [vmem:[%s859_s27 + $0xe0] sm:$0xff] }
  0x25   : > { %635 = vmatpush1.bf16.msra.mxu1 %v634_v3  ;;  %v313_v26 = vld [vmem:[%s859_s27 + $0x2f8] sm:$0xff]  ;;  %v644_v29 = vpack.c.bf16 %v249_v24, %v247_v23  ;;  %v248_v31 = vld [vmem:[%s859_s27 + $0xf0] sm:$0xff]  ;;  %v310_v32 = vld [vmem:[%s859_s27 + $0x2e0] sm:$0xff] }
  0x26   : > { %699 = vmatpush1.bf16.msra.mxu0 %v698_v4  ;;  %637 = vmatprep.subr.bf16.mxu1 %v636_v5  ;;  %v708_v33 = vpack.c.bf16 %v313_v26, %v311_v25  ;;  %v312_v34 = vld [vmem:[%s859_s27 + $0x2f0] sm:$0xff]  ;;  %v251_v35 = vld [vmem:[%s859_s27 + $0x108] sm:$0xff]  ;;  %v253_v36 = vld [vmem:[%s859_s27 + $0x118] sm:$0xff]  ;;  %v646_v39 = vpack.c.bf16 %v248_v31, %v246_v30 }
  0x27   : > { %701 = vmatprep.subr.bf16.mxu0 %v700_v9  ;;  %v315_v37 = vld [vmem:[%s859_s27 + $0x308] sm:$0xff]  ;;  %v317_v38 = vld [vmem:[%s859_s27 + $0x318] sm:$0xff]  ;;  %v710_v40 = vpack.c.bf16 %v312_v34, %v310_v32  ;;  %v648_v41 = vpack.c.bf16 %v253_v36, %v251_v35  ;;  %v250_v42 = vld [vmem:[%s859_s27 + $0x100] sm:$0xff] }
  0x28   : > { %v252_v43 = vld [vmem:[%s859_s27 + $0x110] sm:$0xff]  ;;  %v314_v44 = vld [vmem:[%s859_s27 + $0x300] sm:$0xff]  ;;  %v712_v45 = vpack.c.bf16 %v317_v38, %v315_v37  ;;  %v255_v47 = vld [vmem:[%s859_s27 + $0x128] sm:$0xff] }
  0x29   : > { %639 = vmatpush1.bf16.msra.mxu1 %v638_v15  ;;  %v316_v46 = vld [vmem:[%s859_s27 + $0x310] sm:$0xff]  ;;  %v257_v48 = vld [vmem:[%s859_s27 + $0x138] sm:$0xff]  ;;  %v319_v49 = vld [vmem:[%s859_s27 + $0x328] sm:$0xff]  ;;  %v650_v51 = vpack.c.bf16 %v252_v43, %v250_v42 }
  0x2a   : > { %703 = vmatpush1.bf16.msra.mxu0 %v702_v16  ;;  %641 = vmatprep.subr.bf16.mxu1 %v640_v17  ;;  %v321_v50 = vld [vmem:[%s859_s27 + $0x338] sm:$0xff]  ;;  %v714_v52 = vpack.c.bf16 %v316_v46, %v314_v44  ;;  %v652_v53 = vpack.c.bf16 %v257_v48, %v255_v47  ;;  %v254_v54 = vld [vmem:[%s859_s27 + $0x120] sm:$0xff]  ;;  %v256_v55 = vld [vmem:[%s859_s27 + $0x130] sm:$0xff] }
  0x2b   : > { %705 = vmatprep.subr.bf16.mxu0 %v704_v21  ;;  %v318_v56 = vld [vmem:[%s859_s27 + $0x320] sm:$0xff]  ;;  %v716_v57 = vpack.c.bf16 %v321_v50, %v319_v49  ;;  %v320_v58 = vld [vmem:[%s859_s27 + $0x330] sm:$0xff]  ;;  %v259_v59 = vld [vmem:[%s859_s27 + $0x148] sm:$0xff]  ;;  %v654_v63 = vpack.c.bf16 %v256_v55, %v254_v54 }
  0x2c   : > { %v261_v60 = vld [vmem:[%s859_s27 + $0x158] sm:$0xff]  ;;  %v323_v61 = vld [vmem:[%s859_s27 + $0x348] sm:$0xff]  ;;  %v718_v0 = vpack.c.bf16 %v320_v58, %v318_v56  ;;  %v258_v2 = vld [vmem:[%s859_s27 + $0x140] sm:$0xff] }
  0x2d   : > { %643 = vmatpush1.bf16.msra.mxu1 %v642_v27  ;;  %v325_v62 = vld [vmem:[%s859_s27 + $0x358] sm:$0xff]  ;;  %v656_v1 = vpack.c.bf16 %v261_v60, %v259_v59  ;;  %v260_v3 = vld [vmem:[%s859_s27 + $0x150] sm:$0xff]  ;;  %v322_v4 = vld [vmem:[%s859_s27 + $0x340] sm:$0xff] }
  0x2e   : > { %707 = vmatpush1.bf16.msra.mxu0 %v706_v28  ;;  %645 = vmatprep.subr.bf16.mxu1 %v644_v29  ;;  %v720_v5 = vpack.c.bf16 %v325_v62, %v323_v61  ;;  %v324_v6 = vld [vmem:[%s859_s27 + $0x350] sm:$0xff]  ;;  %v263_v7 = vld [vmem:[%s859_s27 + $0x168] sm:$0xff]  ;;  %v265_v8 = vld [vmem:[%s859_s27 + $0x178] sm:$0xff]  ;;  %v658_v11 = vpack.c.bf16 %v260_v3, %v258_v2 }
  0x2f   : > { %709 = vmatprep.subr.bf16.mxu0 %v708_v33  ;;  %v327_v9 = vld [vmem:[%s859_s27 + $0x368] sm:$0xff]  ;;  %v329_v10 = vld [vmem:[%s859_s27 + $0x378] sm:$0xff]  ;;  %v722_v12 = vpack.c.bf16 %v324_v6, %v322_v4  ;;  %v660_v13 = vpack.c.bf16 %v265_v8, %v263_v7  ;;  %v262_v14 = vld [vmem:[%s859_s27 + $0x160] sm:$0xff] }
  0x30   : > { %v264_v15 = vld [vmem:[%s859_s27 + $0x170] sm:$0xff]  ;;  %v326_v16 = vld [vmem:[%s859_s27 + $0x360] sm:$0xff]  ;;  %v724_v17 = vpack.c.bf16 %v329_v10, %v327_v9  ;;  %v267_v19 = vld [vmem:[%s859_s27 + $0x188] sm:$0xff] }
  0x31   : > { %647 = vmatpush1.bf16.msra.mxu1 %v646_v39  ;;  %v328_v18 = vld [vmem:[%s859_s27 + $0x370] sm:$0xff]  ;;  %v269_v20 = vld [vmem:[%s859_s27 + $0x198] sm:$0xff]  ;;  %v331_v21 = vld [vmem:[%s859_s27 + $0x388] sm:$0xff]  ;;  %v662_v23 = vpack.c.bf16 %v264_v15, %v262_v14 }
  0x32   : > { %711 = vmatpush1.bf16.msra.mxu0 %v710_v40  ;;  %649 = vmatprep.subr.bf16.mxu1 %v648_v41  ;;  %v333_v22 = vld [vmem:[%s859_s27 + $0x398] sm:$0xff]  ;;  %v726_v24 = vpack.c.bf16 %v328_v18, %v326_v16  ;;  %v664_v25 = vpack.c.bf16 %v269_v20, %v267_v19  ;;  %v266_v26 = vld [vmem:[%s859_s27 + $0x180] sm:$0xff]  ;;  %v268_v27 = vld [vmem:[%s859_s27 + $0x190] sm:$0xff] }
  0x33   : > { %713 = vmatprep.subr.bf16.mxu0 %v712_v45  ;;  %v330_v28 = vld [vmem:[%s859_s27 + $0x380] sm:$0xff]  ;;  %v728_v29 = vpack.c.bf16 %v333_v22, %v331_v21  ;;  %v332_v30 = vld [vmem:[%s859_s27 + $0x390] sm:$0xff]  ;;  %v271_v31 = vld [vmem:[%s859_s27 + $0x1a8] sm:$0xff]  ;;  %v666_v35 = vpack.c.bf16 %v268_v27, %v266_v26 }
  0x34   : > { %v273_v32 = vld [vmem:[%s859_s27 + $0x1b8] sm:$0xff]  ;;  %v335_v33 = vld [vmem:[%s859_s27 + $0x3a8] sm:$0xff]  ;;  %v730_v36 = vpack.c.bf16 %v332_v30, %v330_v28  ;;  %v270_v38 = vld [vmem:[%s859_s27 + $0x1a0] sm:$0xff] }
  0x35   : > { %651 = vmatpush1.bf16.msra.mxu1 %v650_v51  ;;  %v337_v34 = vld [vmem:[%s859_s27 + $0x3b8] sm:$0xff]  ;;  %v668_v37 = vpack.c.bf16 %v273_v32, %v271_v31  ;;  %v272_v39 = vld [vmem:[%s859_s27 + $0x1b0] sm:$0xff]  ;;  %v334_v40 = vld [vmem:[%s859_s27 + $0x3a0] sm:$0xff] }
  0x36   : > { %715 = vmatpush1.bf16.msra.mxu0 %v714_v52  ;;  %653 = vmatprep.subr.bf16.mxu1 %v652_v53  ;;  %v732_v41 = vpack.c.bf16 %v337_v34, %v335_v33  ;;  %v336_v42 = vld [vmem:[%s859_s27 + $0x3b0] sm:$0xff]  ;;  %v275_v43 = vld [vmem:[%s859_s27 + $0x1c8] sm:$0xff]  ;;  %v277_v44 = vld [vmem:[%s859_s27 + $0x1d8] sm:$0xff]  ;;  %v670_v47 = vpack.c.bf16 %v272_v39, %v270_v38 }
  0x37   : > { %717 = vmatprep.subr.bf16.mxu0 %v716_v57  ;;  %v339_v45 = vld [vmem:[%s859_s27 + $0x3c8] sm:$0xff]  ;;  %v341_v46 = vld [vmem:[%s859_s27 + $0x3d8] sm:$0xff]  ;;  %v734_v48 = vpack.c.bf16 %v336_v42, %v334_v40  ;;  %v672_v49 = vpack.c.bf16 %v277_v44, %v275_v43  ;;  %v274_v50 = vld [vmem:[%s859_s27 + $0x1c0] sm:$0xff] }
  0x38   : > { %v276_v51 = vld [vmem:[%s859_s27 + $0x1d0] sm:$0xff]  ;;  %v338_v52 = vld [vmem:[%s859_s27 + $0x3c0] sm:$0xff]  ;;  %v736_v53 = vpack.c.bf16 %v341_v46, %v339_v45  ;;  %v279_v55 = vld [vmem:[%s859_s27 + $0x1e8] sm:$0xff] }
  0x39   : > { %655 = vmatpush1.bf16.msra.mxu1 %v654_v63  ;;  %v340_v54 = vld [vmem:[%s859_s27 + $0x3d0] sm:$0xff]  ;;  %v281_v56 = vld [vmem:[%s859_s27 + $0x1f8] sm:$0xff]  ;;  %v343_v57 = vld [vmem:[%s859_s27 + $0x3e8] sm:$0xff]  ;;  %v674_v59 = vpack.c.bf16 %v276_v51, %v274_v50 }
  0x3a   : > { %719 = vmatpush1.bf16.msra.mxu0 %v718_v0  ;;  %657 = vmatprep.subr.bf16.mxu1 %v656_v1  ;;  %v345_v58 = vld [vmem:[%s859_s27 + $0x3f8] sm:$0xff]  ;;  %v738_v60 = vpack.c.bf16 %v340_v54, %v338_v52  ;;  %v676_v61 = vpack.c.bf16 %v281_v56, %v279_v55  ;;  %v278_v62 = vld [vmem:[%s859_s27 + $0x1e0] sm:$0xff]  ;;  %v280_v63 = vld [vmem:[%s859_s27 + $0x1f0] sm:$0xff] }
  0x3b   : > { %721 = vmatprep.subr.bf16.mxu0 %v720_v5  ;;  %v740_v0 = vpack.c.bf16 %v345_v58, %v343_v57  ;;  %v342_v1 = vld [vmem:[%s859_s27 + $0x3e0] sm:$0xff]  ;;  %v344_v2 = vld [vmem:[%s859_s27 + $0x3f0] sm:$0xff]  ;;  %v678_v3 = vpack.c.bf16 %v280_v63, %v278_v62  ;;  %v215_v7 = vld [vmem:[%s1021_s1 + $0x28] sm:$0xf] }
  0x3c   : > { %v742_v4 = vpack.c.bf16 %v344_v2, %v342_v1  ;;  %v210_v5 = vld [vmem:[%s1021_s1] sm:$0xff]  ;;  %v212_v6 = vld [vmem:[%s1021_s1 + $0x10] sm:$0xff]  ;;  %v217_v8 = vld [vmem:[%s1021_s1 + $0x38] sm:$0xf] }
  0x3d   : > { %659 = vmatpush1.bf16.msra.mxu1 %v658_v11  ;;  %v214_v9 = vld [vmem:[%s1021_s1 + $0x20] sm:$0xf]  ;;  %v216_v10 = vld [vmem:[%s1021_s1 + $0x30] sm:$0xf] }
  0x3e   : > { %723 = vmatpush1.bf16.msra.mxu0 %v722_v12  ;;  %661 = vmatprep.subr.bf16.mxu1 %v660_v13 }
  0x3f   : > { %725 = vmatprep.subr.bf16.mxu0 %v724_v17 }
  0x41   : > { %663 = vmatpush1.bf16.msra.mxu1 %v662_v23 }
  0x42   : > { %727 = vmatpush1.bf16.msra.mxu0 %v726_v24  ;;  %665 = vmatprep.subr.bf16.mxu1 %v664_v25 }
  0x43   : > { %729 = vmatprep.subr.bf16.mxu0 %v728_v29 }
  0x45   : > { %667 = vmatpush1.bf16.msra.mxu1 %v666_v35 }
  0x46   : > { %731 = vmatpush1.bf16.msra.mxu0 %v730_v36  ;;  %669 = vmatprep.subr.bf16.mxu1 %v668_v37 }
  0x47   : > { %733 = vmatprep.subr.bf16.mxu0 %v732_v41 }
  0x49   : > { %671 = vmatpush1.bf16.msra.mxu1 %v670_v47 }
  0x4a   : > { %735 = vmatpush1.bf16.msra.mxu0 %v734_v48  ;;  %673 = vmatprep.subr.bf16.mxu1 %v672_v49 }
  0x4b   : > { %737 = vmatprep.subr.bf16.mxu0 %v736_v53 }
  0x4d   : > { %675 = vmatpush1.bf16.msra.mxu1 %v674_v59 }
  0x4e   : > { %739 = vmatpush1.bf16.msra.mxu0 %v738_v60  ;;  %677 = vmatprep.subr.bf16.mxu1 %v676_v61 }
  0x4f   : > { %741 = vmatprep.subr.bf16.mxu0 %v740_v0 }
  0x51   : > { %679 = vmatpush1.bf16.msra.mxu1 %v678_v3 }
  0x52   : > { %743 = vmatpush1.bf16.msra.mxu0 %v742_v4 }
  0x54   : > { %423 = vmatmul.mubr.f32.vlgmr.msra.gmra.mrb[0].mxu1 %v210_v5 }
  0x55   : > { %500 = vmatmul.mubr.f32.vlgmr.msra.gmra.mrb[0].mxu0 %v212_v6  ;;  %428 = vmatprep.mubr.f32.mxu1 %v215_v7 }
  0x56   : > { %505 = vmatprep.mubr.f32.mxu0 %v217_v8 }
  0x58   : > { %429 = vmatmul.mubr.f32.gmra.mrb[2].mxu1 %v214_v9 }
  0x59   : > { %506 = vmatmul.mubr.f32.gmra.mrb[2].mxu0 %v216_v10 }
  0x88   : > { %v351_v11 = vpop.permute.xlu0 %350 }
  0x8c   : > { %v356_v19 = vpop.permute.xlu0 %355 }
 0x127   : > { %v424_v12 = vpop.f32.mrb[0].mxu1 }
 0x128   : > { %v425_v13 = vadd.f32 %v424_v12, %v351_v11  ;;  %v426_v14 = vpop.f32.mrb[1].mxu1  ;;  %v501_v15 = vpop.f32.mrb[0].mxu0 }
 0x129   : > { %v427_v16 = vadd.f32 %v426_v14, %v351_v11  ;;  %v503_v17 = vpop.f32.mrb[1].mxu0 }
 0x12a   : > { %v502_v18 = vadd.f32 %v501_v15, %v425_v13 }
 0x12b   : > { %v504_v20 = vadd.f32 %v503_v17, %v427_v16  ;;  %v430_v21 = vpop.f32.mrb[2].mxu1 }
 0x12c   : > { %512 = vst [vmem:[%s208_s20] sm:$0xff] %v502_v18  ;;  %v431_v22 = vadd.f32 %v430_v21, %v356_v19  ;;  %v432_v23 = vpop.f32.mrb[3].mxu1  ;;  %v507_v24 = vpop.f32.mrb[2].mxu0 }
 0x12d   : > { %513 = vst [vmem:[%s208_s20 + $0x8] sm:$0xff] %v504_v20  ;;  %v433_v25 = vadd.f32 %v432_v23, %v356_v19  ;;  %v509_v26 = vpop.f32.mrb[3].mxu0 }
 0x12e   : > { %v508_v27 = vadd.f32 %v507_v24, %v431_v22 }
 0x12f   : > { %v510_v28 = vadd.f32 %v509_v26, %v433_v25 }
 0x130   : > { %514 = vst [vmem:[%s208_s20 + $0x10] sm:$0xf] %v508_v27 }
 0x131   : > { %515 = vst [vmem:[%s208_s20 + $0x18] sm:$0xf] %v510_v28 }
 0x132 PF: > { %s13_s14 = sadd.s32 1, %s800_s14   ;;  %s1024_s12 = smov %s796_s13 }
 0x133   : > { %p10_p5 = scmp.ge.s32.totalorder %s13_s14, 4   ;;  %s1025_s13 = smov %s1027_s15 }
 0x135   :  { %12 = sbr.rel (!%p10_p5) target bundleno = 2 (0x2), region = 62 }

</bundles_post_ra>
